<compile_context>
chip_gen: v7x
topology: tpu7x:2x2x1
jax: 0.10.0
libtpu: 0.0.40
codegen_flags: <defaults>
</compile_context>

<pallas_src>
import jax
import jax.numpy as jnp
from jax.experimental import pallas as pl
from jax.experimental.pallas import tpu as pltpu

FIRST_HIDDEN_LAYER_SIZE = 100
SECOND_HIDDEN_LAYER_SIZE = 50
OUTPUT_LAYER_SIZE = 10
BN_EPS = 1e-5

# Lane-padded sizes (multiples of 128).
H1P = 128
H2P = 128
OUTP = 128

NEG_MASK = -1e30  # value for padded logit columns (drops out of max / logsumexp)


# ---------------------------------------------------------------------------
# Kernel
# ---------------------------------------------------------------------------
def _modeld_kernel(x_ref,
                   w0_ref, g1_ref, be1_ref,
                   w1_ref, g2_ref, be2_ref,
                   w2_ref, b2_ref,
                   out_ref):
    x = x_ref[...]                                    # (B, D) bf16

    # ---- fc0 (bias cancelled by BN) + BatchNorm1d(batch stats, fused affine) + ReLU ----
    h = jnp.dot(x, w0_ref[...], preferred_element_type=jnp.float32)   # (B, H1P) f32
    mu = jnp.mean(h, axis=0, keepdims=True)
    var = jnp.mean((h - mu) * (h - mu), axis=0, keepdims=True)         # biased, like PyTorch
    scale = g1_ref[...] * jax.lax.rsqrt(var + BN_EPS)                  # (1, H1P); 0 on pad
    shift = be1_ref[...] - mu * scale
    h = jnp.maximum(h * scale + shift, 0.0).astype(jnp.bfloat16)

    # ---- fc1 + BatchNorm1d + ReLU ----
    h = jnp.dot(h, w1_ref[...], preferred_element_type=jnp.float32)    # (B, H2P) f32
    mu = jnp.mean(h, axis=0, keepdims=True)
    var = jnp.mean((h - mu) * (h - mu), axis=0, keepdims=True)
    scale = g2_ref[...] * jax.lax.rsqrt(var + BN_EPS)
    shift = be2_ref[...] - mu * scale
    h = jnp.maximum(h * scale + shift, 0.0).astype(jnp.bfloat16)

    # ---- fc2 + log_softmax over dim=1 (padded columns carry -1e30 via b2 padding) ----
    logits = jnp.dot(h, w2_ref[...], preferred_element_type=jnp.float32) + b2_ref[...]
    m = jnp.max(logits, axis=1, keepdims=True)
    z = logits - m
    lse = jnp.log(jnp.sum(jnp.exp(z), axis=1, keepdims=True))
    out_ref[...] = z - lse                                              # (B, OUTP) f32


# ---------------------------------------------------------------------------
# Wrapper
# ---------------------------------------------------------------------------
def _full_spec(shape):
    """Whole-array-as-one-block BlockSpec with a correctly bound index_map."""
    zeros = (0,) * len(shape)
    return pl.BlockSpec(shape, lambda zeros=zeros: zeros)


def modeld_forward(x, kparams):
    """x: (B, image_size) f32. kparams: lane-padded kernel params (see prepare_kernel_params)."""
    B = x.shape[0]
    x_bf16 = x.astype(jnp.bfloat16)
    args = (
        x_bf16,
        kparams["w0"], kparams["g1"], kparams["be1"],
        kparams["w1"], kparams["g2"], kparams["be2"],
        kparams["w2"], kparams["b2"],
    )
    in_specs = [_full_spec(a.shape) for a in args]
    out_spec = pl.BlockSpec((B, OUTP), lambda: (0, 0))
    out = pl.pallas_call(
        _modeld_kernel,
        grid=(),
        in_specs=in_specs,
        out_specs=out_spec,
        out_shape=jax.ShapeDtypeStruct((B, OUTP), jnp.float32),
        compiler_params=pltpu.CompilerParams(vmem_limit_bytes=16 * 1024 * 1024),
    )(*args)
    return out[:, :OUTPUT_LAYER_SIZE]


# ---------------------------------------------------------------------------
# Params (logical, PyTorch-default-like) + padded kernel params
# ---------------------------------------------------------------------------
def init_params(key, image_size):
    """nn.Linear-style init (uniform +/- 1/sqrt(fan_in)); BatchNorm gamma=1, beta=0."""
    def linear(k, fan_in, fan_out):
        kw, kb = jax.random.split(k)
        bound = 1.0 / jnp.sqrt(fan_in)
        w = jax.random.uniform(kw, (fan_in, fan_out), jnp.float32, -bound, bound)
        b = jax.random.uniform(kb, (1, fan_out), jnp.float32, -bound, bound)
        return w, b

    k0, k1, k2 = jax.random.split(key, 3)
    w0, b0 = linear(k0, image_size, FIRST_HIDDEN_LAYER_SIZE)
    w1, b1 = linear(k1, FIRST_HIDDEN_LAYER_SIZE, SECOND_HIDDEN_LAYER_SIZE)
    w2, b2 = linear(k2, SECOND_HIDDEN_LAYER_SIZE, OUTPUT_LAYER_SIZE)
    return {
        "w0": w0, "b0": b0,
        "g1": jnp.ones((1, FIRST_HIDDEN_LAYER_SIZE), jnp.float32),
        "be1": jnp.zeros((1, FIRST_HIDDEN_LAYER_SIZE), jnp.float32),
        "w1": w1, "b1": b1,
        "g2": jnp.ones((1, SECOND_HIDDEN_LAYER_SIZE), jnp.float32),
        "be2": jnp.zeros((1, SECOND_HIDDEN_LAYER_SIZE), jnp.float32),
        "w2": w2, "b2": b2,
    }


def _pad2d(a, rows, cols, fill=0.0):
    out = jnp.full((rows, cols), fill, a.dtype)
    return out.at[: a.shape[0], : a.shape[1]].set(a)


def prepare_kernel_params(p, image_size):
    """Pad to 128-lane widths once; weights as bf16 (MXU operands), BN/b2 vectors as f32.

    Zero-padded gamma/beta keep padded channels exactly 0 after BN; the padded fc2 bias
    columns are filled with NEG_MASK so padded logits vanish in the softmax.
    """
    return {
        "w0": _pad2d(p["w0"], image_size, H1P).astype(jnp.bfloat16),
        "g1": _pad2d(p["g1"], 1, H1P),
        "be1": _pad2d(p["be1"], 1, H1P),
        "w1": _pad2d(p["w1"], H1P, H2P).astype(jnp.bfloat16),
        "g2": _pad2d(p["g2"], 1, H2P),
        "be2": _pad2d(p["be2"], 1, H2P),
        "w2": _pad2d(p["w2"], H2P, OUTP).astype(jnp.bfloat16),
        "b2": _pad2d(p["b2"], 1, OUTP, fill=NEG_MASK),
    }


# ---------------------------------------------------------------------------
# References
# ---------------------------------------------------------------------------
def reference_forward_f32(x, p):
    """Pure f32 reference of ModelD.forward (training-mode BN), with the fc0/fc1 biases."""
    h = x @ p["w0"] + p["b0"]
    mu = h.mean(0, keepdims=True); var = ((h - mu) ** 2).mean(0, keepdims=True)
    h = jnp.maximum((h - mu) / jnp.sqrt(var + BN_EPS) * p["g1"] + p["be1"], 0.0)
    h = h @ p["w1"] + p["b1"]
    mu = h.mean(0, keepdims=True); var = ((h - mu) ** 2).mean(0, keepdims=True)
    h = jnp.maximum((h - mu) / jnp.sqrt(var + BN_EPS) * p["g2"] + p["be2"], 0.0)
    logits = h @ p["w2"] + p["b2"]
    return jax.nn.log_softmax(logits, axis=1)


def reference_forward_bf16(x, p):
    """Pure-JAX reference mirroring the kernel's arithmetic (bf16 MXU operands, f32 accum,
    biases-before-BN dropped, fused BN affine)."""
    xb = x.astype(jnp.bfloat16)
    h = jnp.dot(xb, p["w0"].astype(jnp.bfloat16), preferred_element_type=jnp.float32)
    mu = h.mean(0, keepdims=True); var = ((h - mu) ** 2).mean(0, keepdims=True)
    s = p["g1"] * jax.lax.rsqrt(var + BN_EPS)
    h = jnp.maximum(h * s + (p["be1"] - mu * s), 0.0).astype(jnp.bfloat16)
    h = jnp.dot(h, p["w1"].astype(jnp.bfloat16), preferred_element_type=jnp.float32)
    mu = h.mean(0, keepdims=True); var = ((h - mu) ** 2).mean(0, keepdims=True)
    s = p["g2"] * jax.lax.rsqrt(var + BN_EPS)
    h = jnp.maximum(h * s + (p["be2"] - mu * s), 0.0).astype(jnp.bfloat16)
    logits = jnp.dot(h, p["w2"].astype(jnp.bfloat16), preferred_element_type=jnp.float32) + p["b2"]
    return jax.nn.log_softmax(logits, axis=1)


# ---------------------------------------------------------------------------
if __name__ == "__main__":
    IMAGE_SIZE = 64   # e.g. 8x8 "images"
    BATCH = 8

    key = jax.random.PRNGKey(0)
    kx, kp = jax.random.split(key)
    # Input shaped like (B, 1, 8, 8); forward does x.view(-1, image_size).
    x_img = jax.random.normal(kx, (BATCH, 1, 8, 8), jnp.float32)
    x = x_img.reshape(-1, IMAGE_SIZE)

    params = init_params(kp, IMAGE_SIZE)
    kparams = prepare_kernel_params(params, IMAGE_SIZE)

    out = jax.block_until_ready(modeld_forward(x, kparams))
    assert out.shape == (BATCH, OUTPUT_LAYER_SIZE)

    # Exact-arithmetic check vs a reference that mirrors the kernel's precision choices.
    ref_bf16 = reference_forward_bf16(x, params)
    assert jnp.allclose(out, ref_bf16, atol=5e-3, rtol=5e-3), "mismatch vs bf16-mirrored reference"

    # Semantics check vs the full-precision original forward (bf16 MXU rounding allowance).
    ref_f32 = reference_forward_f32(x, params)
    assert jnp.allclose(out, ref_f32, atol=1e-1), "mismatch vs f32 reference"

    # log_softmax rows should exp-sum to 1.
    assert jnp.allclose(jnp.exp(out).sum(axis=1), 1.0, atol=1e-3)

    print("KERNEL_OK")
</pallas_src>

<mosaic_0001>
module attributes {stable_mosaic.version = 11 : i64} {
  func.func @_modeld_kernel(%arg0: memref<8x64xbf16, #tpu.memory_space<vmem>>, %arg1: memref<64x128xbf16, #tpu.memory_space<vmem>>, %arg2: memref<1x128xf32, #tpu.memory_space<vmem>>, %arg3: memref<1x128xf32, #tpu.memory_space<vmem>>, %arg4: memref<128x128xbf16, #tpu.memory_space<vmem>>, %arg5: memref<1x128xf32, #tpu.memory_space<vmem>>, %arg6: memref<1x128xf32, #tpu.memory_space<vmem>>, %arg7: memref<128x128xbf16, #tpu.memory_space<vmem>>, %arg8: memref<1x128xf32, #tpu.memory_space<vmem>>, %arg9: memref<8x128xf32, #tpu.memory_space<vmem>>) attributes {dimension_semantics = [], scalar_prefetch = 0 : i64, scratch_operands = 0 : i64, tpu.core_type = #tpu.core_type<tc>} {
    %c0 = arith.constant 0 : index
    %c0_0 = arith.constant 0 : index
    %0 = vector.load %arg0[%c0, %c0_0] : memref<8x64xbf16, #tpu.memory_space<vmem>>, vector<8x64xbf16>
    %c0_1 = arith.constant 0 : index
    %c0_2 = arith.constant 0 : index
    %1 = vector.load %arg1[%c0_1, %c0_2] : memref<64x128xbf16, #tpu.memory_space<vmem>>, vector<64x128xbf16>
    %cst = arith.constant dense<0.000000e+00> : vector<8x128xf32>
    %2 = tpu.matmul %0, %1, %cst {dimension_numbers = #tpu.dot_dimension_numbers<[1], [0], [0], [1], [0, 0, 1, 1], [], []>} : vector<8x64xbf16>, vector<64x128xbf16>, vector<8x128xf32> -> vector<8x128xf32>
    %cst_3 = arith.constant dense<0.000000e+00> : vector<128xf32>
    %3 = vector.multi_reduction <add>, %2, %cst_3 [0] : vector<8x128xf32> to vector<128xf32>
    %4 = vector.shape_cast %3 : vector<128xf32> to vector<1x128xf32>
    %cst_4 = arith.constant 8.000000e+00 : f32
    %5 = vector.broadcast %cst_4 : f32 to vector<1x128xf32>
    %6 = arith.divf %4, %5 : vector<1x128xf32>
    %7 = vector.broadcast %6 : vector<1x128xf32> to vector<8x128xf32>
    %8 = arith.subf %2, %7 : vector<8x128xf32>
    %9 = vector.broadcast %6 : vector<1x128xf32> to vector<8x128xf32>
    %10 = arith.subf %2, %9 : vector<8x128xf32>
    %11 = arith.mulf %8, %10 : vector<8x128xf32>
    %cst_5 = arith.constant dense<0.000000e+00> : vector<128xf32>
    %12 = vector.multi_reduction <add>, %11, %cst_5 [0] : vector<8x128xf32> to vector<128xf32>
    %13 = vector.shape_cast %12 : vector<128xf32> to vector<1x128xf32>
    %cst_6 = arith.constant 8.000000e+00 : f32
    %14 = vector.broadcast %cst_6 : f32 to vector<1x128xf32>
    %15 = arith.divf %13, %14 : vector<1x128xf32>
    %c0_7 = arith.constant 0 : index
    %c0_8 = arith.constant 0 : index
    %16 = vector.load %arg2[%c0_7, %c0_8] : memref<1x128xf32, #tpu.memory_space<vmem>>, vector<1x128xf32>
    %cst_9 = arith.constant 9.99999974E-6 : f32
    %17 = vector.broadcast %cst_9 : f32 to vector<1x128xf32>
    %18 = arith.addf %15, %17 : vector<1x128xf32>
    %19 = math.rsqrt %18 : vector<1x128xf32>
    %20 = arith.mulf %16, %19 : vector<1x128xf32>
    %c0_10 = arith.constant 0 : index
    %c0_11 = arith.constant 0 : index
    %21 = vector.load %arg3[%c0_10, %c0_11] : memref<1x128xf32, #tpu.memory_space<vmem>>, vector<1x128xf32>
    %22 = arith.mulf %6, %20 : vector<1x128xf32>
    %23 = arith.subf %21, %22 : vector<1x128xf32>
    %24 = vector.broadcast %20 : vector<1x128xf32> to vector<8x128xf32>
    %25 = arith.mulf %2, %24 : vector<8x128xf32>
    %26 = vector.broadcast %23 : vector<1x128xf32> to vector<8x128xf32>
    %27 = arith.addf %25, %26 : vector<8x128xf32>
    %cst_12 = arith.constant 0.000000e+00 : f32
    %28 = vector.broadcast %cst_12 : f32 to vector<8x128xf32>
    %29 = arith.maximumf %27, %28 : vector<8x128xf32>
    %30 = arith.truncf %29 : vector<8x128xf32> to vector<8x128xbf16>
    %c0_13 = arith.constant 0 : index
    %c0_14 = arith.constant 0 : index
    %31 = vector.load %arg4[%c0_13, %c0_14] : memref<128x128xbf16, #tpu.memory_space<vmem>>, vector<128x128xbf16>
    %cst_15 = arith.constant dense<0.000000e+00> : vector<8x128xf32>
    %32 = tpu.matmul %30, %31, %cst_15 {dimension_numbers = #tpu.dot_dimension_numbers<[1], [0], [0], [1], [0, 0, 1, 1], [], []>} : vector<8x128xbf16>, vector<128x128xbf16>, vector<8x128xf32> -> vector<8x128xf32>
    %cst_16 = arith.constant dense<0.000000e+00> : vector<128xf32>
    %33 = vector.multi_reduction <add>, %32, %cst_16 [0] : vector<8x128xf32> to vector<128xf32>
    %34 = vector.shape_cast %33 : vector<128xf32> to vector<1x128xf32>
    %cst_17 = arith.constant 8.000000e+00 : f32
    %35 = vector.broadcast %cst_17 : f32 to vector<1x128xf32>
    %36 = arith.divf %34, %35 : vector<1x128xf32>
    %37 = vector.broadcast %36 : vector<1x128xf32> to vector<8x128xf32>
    %38 = arith.subf %32, %37 : vector<8x128xf32>
    %39 = vector.broadcast %36 : vector<1x128xf32> to vector<8x128xf32>
    %40 = arith.subf %32, %39 : vector<8x128xf32>
    %41 = arith.mulf %38, %40 : vector<8x128xf32>
    %cst_18 = arith.constant dense<0.000000e+00> : vector<128xf32>
    %42 = vector.multi_reduction <add>, %41, %cst_18 [0] : vector<8x128xf32> to vector<128xf32>
    %43 = vector.shape_cast %42 : vector<128xf32> to vector<1x128xf32>
    %cst_19 = arith.constant 8.000000e+00 : f32
    %44 = vector.broadcast %cst_19 : f32 to vector<1x128xf32>
    %45 = arith.divf %43, %44 : vector<1x128xf32>
    %c0_20 = arith.constant 0 : index
    %c0_21 = arith.constant 0 : index
    %46 = vector.load %arg5[%c0_20, %c0_21] : memref<1x128xf32, #tpu.memory_space<vmem>>, vector<1x128xf32>
    %cst_22 = arith.constant 9.99999974E-6 : f32
    %47 = vector.broadcast %cst_22 : f32 to vector<1x128xf32>
    %48 = arith.addf %45, %47 : vector<1x128xf32>
    %49 = math.rsqrt %48 : vector<1x128xf32>
    %50 = arith.mulf %46, %49 : vector<1x128xf32>
    %c0_23 = arith.constant 0 : index
    %c0_24 = arith.constant 0 : index
    %51 = vector.load %arg6[%c0_23, %c0_24] : memref<1x128xf32, #tpu.memory_space<vmem>>, vector<1x128xf32>
    %52 = arith.mulf %36, %50 : vector<1x128xf32>
    %53 = arith.subf %51, %52 : vector<1x128xf32>
    %54 = vector.broadcast %50 : vector<1x128xf32> to vector<8x128xf32>
    %55 = arith.mulf %32, %54 : vector<8x128xf32>
    %56 = vector.broadcast %53 : vector<1x128xf32> to vector<8x128xf32>
    %57 = arith.addf %55, %56 : vector<8x128xf32>
    %cst_25 = arith.constant 0.000000e+00 : f32
    %58 = vector.broadcast %cst_25 : f32 to vector<8x128xf32>
    %59 = arith.maximumf %57, %58 : vector<8x128xf32>
    %60 = arith.truncf %59 : vector<8x128xf32> to vector<8x128xbf16>
    %c0_26 = arith.constant 0 : index
    %c0_27 = arith.constant 0 : index
    %61 = vector.load %arg7[%c0_26, %c0_27] : memref<128x128xbf16, #tpu.memory_space<vmem>>, vector<128x128xbf16>
    %cst_28 = arith.constant dense<0.000000e+00> : vector<8x128xf32>
    %62 = tpu.matmul %60, %61, %cst_28 {dimension_numbers = #tpu.dot_dimension_numbers<[1], [0], [0], [1], [0, 0, 1, 1], [], []>} : vector<8x128xbf16>, vector<128x128xbf16>, vector<8x128xf32> -> vector<8x128xf32>
    %c0_29 = arith.constant 0 : index
    %c0_30 = arith.constant 0 : index
    %63 = vector.load %arg8[%c0_29, %c0_30] : memref<1x128xf32, #tpu.memory_space<vmem>>, vector<1x128xf32>
    %64 = vector.broadcast %63 : vector<1x128xf32> to vector<8x128xf32>
    %65 = arith.addf %62, %64 : vector<8x128xf32>
    %cst_31 = arith.constant dense<0xFF800000> : vector<8xf32>
    %66 = vector.multi_reduction <maximumf>, %65, %cst_31 [1] : vector<8x128xf32> to vector<8xf32>
    %67 = vector.shape_cast %66 : vector<8xf32> to vector<8x1xf32>
    %68 = vector.broadcast %67 : vector<8x1xf32> to vector<8x128xf32>
    %69 = arith.subf %65, %68 : vector<8x128xf32>
    %70 = math.exp %69 : vector<8x128xf32>
    %cst_32 = arith.constant dense<0.000000e+00> : vector<8xf32>
    %71 = vector.multi_reduction <add>, %70, %cst_32 [1] : vector<8x128xf32> to vector<8xf32>
    %72 = vector.shape_cast %71 : vector<8xf32> to vector<8x1xf32>
    %73 = math.log %72 : vector<8x1xf32>
    %74 = vector.broadcast %73 : vector<8x1xf32> to vector<8x128xf32>
    %75 = arith.subf %69, %74 : vector<8x128xf32>
    %c0_33 = arith.constant 0 : index
    %c0_34 = arith.constant 0 : index
    %76 = vector.load %arg9[%c0_33, %c0_34] : memref<8x128xf32, #tpu.memory_space<vmem>>, vector<8x128xf32>
    tpu.vector_store %arg9[%c0_33, %c0_34], %75 {strides = array<i32>} : memref<8x128xf32, #tpu.memory_space<vmem>>, vector<8x128xf32>,
    return
  }
}

</mosaic_0001>

<bundles_post_ra>
// kernel: tpu_custom_call.1
= control target key start
LH: loop header
LB: loop body
LE: loop exit
PB: predicated region body
PF: predicated region fallthrough
CT: control target
= control target key end

     0   :  { %14 = vsyncpa [#allocation3], 0  ;;  %s913_s0 = inlined_call_operand.hbm [shape: bf16[8,64], index: 0, kind: input, shape index: {}]   ;;  %s914_s1 = inlined_call_operand.hbm [shape: bf16[64,128], index: 1, kind: input, shape index: {}]   ;;  %s915_s2 = inlined_call_operand.vmem [shape: f32[1,128], index: 2, kind: input, shape index: {}]   ;;  %s916_s3 = inlined_call_operand.vmem [shape: f32[1,128], index: 3, kind: input, shape index: {}]   ;;  %s917_s4 = inlined_call_operand.hbm [shape: bf16[128,128], index: 4, kind: input, shape index: {}]   ;;  %s918_s5 = inlined_call_operand.vmem [shape: f32[1,128], index: 5, kind: input, shape index: {}]   ;;  %s919_s6 = inlined_call_operand.vmem [shape: f32[1,128], index: 6, kind: input, shape index: {}]   ;;  %s920_s7 = inlined_call_operand.hbm [shape: bf16[128,128], index: 7, kind: input, shape index: {}]   ;;  %s921_s8 = inlined_call_operand.vmem [shape: f32[1,128], index: 8, kind: input, shape index: {}]   ;;  %s922_s9 = inlined_call_operand.hbm [shape: f32[8,128], index: 9, kind: output, shape index: {}]  }
   0x1   :  { %15 = vsyncpa [#allocation6], 0 }
   0x2   :  { %16 = vsyncpa [#allocation9], 0 }
   0x3   :  { %17 = vsyncpa [#allocation4], 0  ;;  %s738_s30 = smov [#allocation5]   ;;  %s620_s13 = scalar_lea.hbm %s914_s1, 512 }
   0x4   :  { %s33_s10 = sshll.u32 %s738_s30, 4  ;;  %p621_p0 = scmp.ne.s32.totalorder %s914_s1, %s620_s13  ;;  %s34_s10 = int_to_ptr.vmem [resolvable:$true] %s33_s10 }
   0x5   :  { %p624_p1 = scmp.lt.u32.totalorder %s620_s13, %s914_s1 }
   0x7   :  { %p626_p2 = pnand %p624_p1, %p621_p0 }
   0x9   :  { %629 = shalt.err (!%p626_p2)
}
   0xa   :  { %s630_s18 = scalar_lea.vmem %s34_s10, 512  ;;  %p635_p4 = scmp.lt.s32.totalorder %s34_s10, %s34_s10 }
   0xb   :  { %p631_p3 = scmp.ne.s32.totalorder %s34_s10, %s630_s18  ;;  %p636_p5 = scmp.lt.s32.totalorder %s630_s18, %s630_s18 }
   0xd   :  { %p637_p6 = por %p636_p5, %p635_p4 }
   0xf   :  { %p638_p7 = pnand %p637_p6, %p631_p3 }
  0x11   :  { %641 = shalt.err (!%p638_p7)
}
  0x12   :  { %s739_s19 = smov 64   ;;  %s740_s20 = smov 4  }
  0x13   :  { %39 = dma.hbm_to_vmem [thread:$0]  %s914_s1, 512, %s34_s10, [#allocation6], %s739_s19, %s739_s19, %s740_s20  }
  0x14   :  { %s741_s23 = smov [#allocation2]   ;;  %s742_s25 = smov [#allocation7]  }
  0x15   :  { %s24_s24 = sshll.u32 %s741_s23, 4  ;;  %s49_s26 = sshll.u32 %s742_s25, 4  ;;  %s25_s24 = int_to_ptr.vmem [resolvable:$true] %s24_s24  ;;  %s50_s26 = int_to_ptr.vmem [resolvable:$true] %s49_s26 }
  0x16   :  { %s642_s29 = scalar_lea.hbm %s913_s0, 64 }
  0x17   :  { %p643_p8 = scmp.ne.s32.totalorder %s913_s0, %s642_s29  ;;  %p646_p9 = scmp.lt.u32.totalorder %s642_s29, %s913_s0 }
  0x19   :  { %p648_p10 = pnand %p646_p9, %p643_p8 }
  0x1b   :  { %651 = shalt.err (!%p648_p10)
}
  0x1c   :  { %s652_s1 = scalar_lea.vmem %s25_s24, 64  ;;  %p657_p12 = scmp.lt.s32.totalorder %s25_s24, %s25_s24 }
  0x1d   :  { %p653_p11 = scmp.ne.s32.totalorder %s25_s24, %s652_s1  ;;  %p658_p13 = scmp.lt.s32.totalorder %s652_s1, %s652_s1 }
  0x1f   :  { %p659_p0 = por %p658_p13, %p657_p12 }
  0x21   :  { %p660_p1 = pnand %p659_p0, %p653_p11 }
  0x23   :  { %663 = shalt.err (!%p660_p1)
}
  0x24   :  { %27 = dma.hbm_to_vmem [thread:$0]  %s913_s0, 64, %s25_s24, [#allocation3]  }
  0x25   :  { %s664_s17 = scalar_lea.hbm %s917_s4, 1024 }
  0x26   :  { %p665_p2 = scmp.ne.s32.totalorder %s917_s4, %s664_s17  ;;  %p668_p3 = scmp.lt.u32.totalorder %s664_s17, %s917_s4 }
  0x28   :  { %p670_p4 = pnand %p668_p3, %p665_p2 }
  0x2a   :  { %673 = shalt.err (!%p670_p4)
}
  0x2b   :  { %s674_s25 = scalar_lea.vmem %s50_s26, 1024  ;;  %p679_p6 = scmp.lt.s32.totalorder %s50_s26, %s50_s26 }
  0x2c   :  { %p675_p5 = scmp.ne.s32.totalorder %s50_s26, %s674_s25  ;;  %p680_p7 = scmp.lt.s32.totalorder %s674_s25, %s674_s25 }
  0x2e   :  { %p681_p8 = por %p680_p7, %p679_p6 }
  0x30   :  { %p682_p9 = pnand %p681_p8, %p675_p5 }
  0x32   :  { %685 = shalt.err (!%p682_p9)
}
  0x33   :  { %55 = dma.hbm_to_vmem [thread:$0]  %s917_s4, 1024, %s50_s26, [#allocation6], %s739_s19, %s739_s19, %s740_s20  }
  0x34   :  { %s743_s27 = smov [#allocation8]   ;;  %s686_s11 = scalar_lea.hbm %s920_s7, 1024 }
  0x35   :  { %s65_s28 = sshll.u32 %s743_s27, 4  ;;  %p687_p10 = scmp.ne.s32.totalorder %s920_s7, %s686_s11  ;;  %s66_s28 = int_to_ptr.vmem [resolvable:$true] %s65_s28 }
  0x36   :  { %p690_p11 = scmp.lt.u32.totalorder %s686_s11, %s920_s7 }
  0x38   :  { %p692_p12 = pnand %p690_p11, %p687_p10 }
  0x3a   :  { %695 = shalt.err (!%p692_p12)
}
  0x3b   :  { %s696_s14 = scalar_lea.vmem %s66_s28, 1024  ;;  %p701_p0 = scmp.lt.s32.totalorder %s66_s28, %s66_s28 }
  0x3c   :  { %p697_p13 = scmp.ne.s32.totalorder %s66_s28, %s696_s14  ;;  %p702_p1 = scmp.lt.s32.totalorder %s696_s14, %s696_s14 }
  0x3e   :  { %p703_p2 = por %p702_p1, %p701_p0 }
  0x40   :  { %p704_p3 = pnand %p703_p2, %p697_p13 }
  0x42   :  { %707 = shalt.err (!%p704_p3)
}
  0x43   :  { %71 = dma.hbm_to_vmem [thread:$0]  %s920_s7, 1024, %s66_s28, [#allocation9], %s739_s19, %s739_s19, %s740_s20  }
  0x44   :  { %730 = dma.done.wait [#allocation3], 64  }
  0x45   :  { %731 = vsyncadd [#allocation3], 4294967232 }
  0x46   :  { %732 = dma.done.wait [#allocation6], 1536  }
  0x47   :  { %733 = vsyncadd [#allocation6], 4294965760 }
  0x48   :  { %734 = dma.done.wait [#allocation9], 1024  }
  0x49   :  { %735 = vsyncadd [#allocation9], 4294966272  ;;  %v744_v0 = vmov 0.0   ;;  %vm745_vm0 = vmmov 0   ;;  %v592_v1 = vld [vmem:[#allocation5] sm:$0xff]   ;;  %v593_v2 = vld [vmem:[#allocation5 + $0x8] sm:$0xff]   ;;  %v189_v35 = vlaneseq }
  0x4a   :  { %531 = vmatprep.subr.bf16.mxu0 %v744_v0  ;;  %539 = vmatprep.mubr.msk.bf16.mxu0 %vm745_vm0, %v744_v0  ;;  %v594_v3 = vld [vmem:[#allocation5 + $0x10] sm:$0xff]   ;;  %vm120_vm1 = vcmask 523264   ;;  %v595_v4 = vld [vmem:[#allocation5 + $0x18] sm:$0xff]   ;;  %v596_v6 = vld [vmem:[#allocation7] sm:$0xff]  }
  0x4b   :  { %543 = vmatprep.subr.bf16.mxu1 %v744_v0  ;;  %559 = vmatprep.mubr.msk.bf16.mxu1 %vm745_vm0, %v744_v0  ;;  %v87_v5 = vld [vmem:[#allocation2] sm:$0xf]  ;;  %v597_v7 = vld [vmem:[#allocation7 + $0x8] sm:$0xff]   ;;  %v598_v8 = vld [vmem:[#allocation7 + $0x10] sm:$0xff]   ;;  %v190_v36 = vshrl.u32 %v189_v35, 7 }
  0x4c   :  { %532 = vmatpush3.bf16.msra.mxu0 %v592_v1  ;;  %544 = vmatpush3.bf16.msra.mxu1 %v596_v6  ;;  %v599_v9 = vld [vmem:[#allocation7 + $0x18] sm:$0xff]   ;;  %v600_v10 = vld [vmem:[#allocation7 + $0x20] sm:$0xff]   ;;  %v601_v11 = vld [vmem:[#allocation7 + $0x28] sm:$0xff]  }
  0x4d   :  { %533 = vmatprep.subr.bf16.mxu0 %v744_v0  ;;  %545 = vmatprep.subr.bf16.mxu1 %v744_v0  ;;  %v602_v12 = vld [vmem:[#allocation7 + $0x30] sm:$0xff]   ;;  %v603_v13 = vld [vmem:[#allocation7 + $0x38] sm:$0xff]   ;;  %v876_v38 = vsub.s32 0, %v190_v36  ;;  %v604_v50 = vld [vmem:[#allocation8] sm:$0xff]  }
  0x4e   :  { %v181_v37 = vld [vmem:[%s915_s2] sm:$0x1]  ;;  %v605_v51 = vld [vmem:[#allocation8 + $0x8] sm:$0xff]   ;;  %v606_v52 = vld [vmem:[#allocation8 + $0x10] sm:$0xff]  }
  0x4f   :  { %v185_v41 = vld [vmem:[%s916_s3] sm:$0x1]  ;;  %v608_v54 = vld [vmem:[#allocation8 + $0x20] sm:$0xff]   ;;  %v609_v55 = vld [vmem:[#allocation8 + $0x28] sm:$0xff]  }
  0x50   :  { %534 = vmatpush3.bf16.msra.mxu0 %v593_v2  ;;  %546 = vmatpush3.bf16.msra.mxu1 %v597_v7  ;;  %v607_v53 = vld [vmem:[#allocation8 + $0x18] sm:$0xff]   ;;  %v610_v56 = vld [vmem:[#allocation8 + $0x30] sm:$0xff]  }
  0x51   :  { %535 = vmatprep.subr.bf16.mxu0 %v744_v0  ;;  %547 = vmatprep.subr.bf16.mxu1 %v744_v0  ;;  %v611_v57 = vld [vmem:[#allocation8 + $0x38] sm:$0xff]  }
  0x54   :  { %536 = vmatpush3.bf16.msra.mxu0 %v594_v3  ;;  %548 = vmatpush3.bf16.msra.mxu1 %v598_v8 }
  0x55   :  { %537 = vmatprep.subr.bf16.mxu0 %v744_v0  ;;  %549 = vmatprep.subr.bf16.mxu1 %v744_v0 }
  0x58   :  { %538 = vmatpush3.bf16.msra.mxu0 %v595_v4  ;;  %550 = vmatpush3.bf16.msra.mxu1 %v599_v9 }
  0x59   :  { %563 = vmatprep.subr.bf16.mxu0 %v744_v0  ;;  %551 = vmatprep.subr.bf16.mxu1 %v744_v0 }
  0x5b   :  { %540 = vmatmul.mubr.msk.bf16.vlgmr.msra.gmra.mrb[0].mxu0 %vm120_vm1, %v87_v5 }
  0x5c   :  { %579 = vmatprep.mubr.msk.bf16.mxu0 %vm745_vm0, %v744_v0  ;;  %552 = vmatpush3.bf16.msra.mxu1 %v600_v10 }
  0x5d   :  { %553 = vmatprep.subr.bf16.mxu1 %v744_v0  ;;  %564 = vmatpush3.bf16.msra.mxu0 %v604_v50 }
  0x5e   :  { %565 = vmatprep.subr.bf16.mxu0 %v744_v0 }
  0x60   :  { %554 = vmatpush3.bf16.msra.mxu1 %v601_v11 }
  0x61   :  { %555 = vmatprep.subr.bf16.mxu1 %v744_v0  ;;  %566 = vmatpush3.bf16.msra.mxu0 %v605_v51 }
  0x62   :  { %567 = vmatprep.subr.bf16.mxu0 %v744_v0 }
  0x64   :  { %556 = vmatpush3.bf16.msra.mxu1 %v602_v12 }
  0x65   :  { %557 = vmatprep.subr.bf16.mxu1 %v744_v0  ;;  %568 = vmatpush3.bf16.msra.mxu0 %v606_v52 }
  0x66   :  { %569 = vmatprep.subr.bf16.mxu0 %v744_v0 }
  0x68   :  { %558 = vmatpush3.bf16.msra.mxu1 %v603_v13 }
  0x69   :  { %570 = vmatpush3.bf16.msra.mxu0 %v607_v53 }
  0x6a   :  { %571 = vmatprep.subr.bf16.mxu0 %v744_v0 }
  0x6d   :  { %572 = vmatpush3.bf16.msra.mxu0 %v608_v54 }
  0x6e   :  { %573 = vmatprep.subr.bf16.mxu0 %v744_v0 }
  0x71   :  { %574 = vmatpush3.bf16.msra.mxu0 %v609_v55 }
  0x72   :  { %575 = vmatprep.subr.bf16.mxu0 %v744_v0 }
  0x75   :  { %576 = vmatpush3.bf16.msra.mxu0 %v610_v56 }
  0x76   :  { %577 = vmatprep.subr.bf16.mxu0 %v744_v0 }
  0x79   :  { %578 = vmatpush3.bf16.msra.mxu0 %v611_v57 }
 0x12e   :  { %v158_v14 = vpop.f32.mrb[0].mxu0 }
 0x12f   :  { %v164_v15 = vrot.slane %v158_v14, 4  ;;  %v541_v16 = vpop.f32.mrb[1].mxu0 }
 0x130   :  { %v161_v17 = vpop.f32.mrb[2].mxu0 }
 0x131   :  { %v165_v18 = vadd.f32 %v164_v15, %v158_v14  ;;  %v542_v19 = vpop.f32.mrb[3].mxu0  ;;  %v324_v15 = vld [vmem:[%s918_s5] sm:$0x1]  ;;  %s746_s5 = smov [#allocation10]  }
 0x133   :  { %v166_v20 = vrot.slane %v165_v18, 2 }
 0x135   :  { %v167_v21 = vadd.f32 %v166_v20, %v165_v18  ;;  %v328_v18 = vld [vmem:[%s919_s6] sm:$0x1]  ;;  %s475_s6 = sshll.u32 %s746_s5, 4  ;;  %s476_s6 = int_to_ptr.vmem [resolvable:$true] %s475_s6 }
 0x136   :  { %p713_p5 = scmp.lt.s32.totalorder %s476_s6, %s476_s6 }
 0x137   :  { %v168_v22 = vrot.slane %v167_v21, 1 }
 0x139   :  { %v169_v23 = vadd.f32 %v168_v22, %v167_v21 }
 0x13b   :  { %v171_v24 = vmul.f32 0.125, %v169_v23 }
 0x13d   :  { %v172_v25 = vsub.f32 %v158_v14, %v171_v24 }
 0x13f   :  { %v173_v26 = vmul.f32 %v172_v25, %v172_v25 }
 0x141   :  { %v174_v27 = vrot.slane %v173_v26, 4 }
 0x143   :  { %v175_v28 = vadd.f32 %v174_v27, %v173_v26  ;;  %v499_v27 = vld [vmem:[%s921_s8] ss:$0 sm:$0xff]  ;;  %s708_s8 = scalar_lea.vmem %s476_s6, 128 }
 0x144   :  { %p709_p4 = scmp.ne.s32.totalorder %s476_s6, %s708_s8  ;;  %p714_p6 = scmp.lt.s32.totalorder %s708_s8, %s708_s8 }
 0x145   :  { %v176_v29 = vrot.slane %v175_v28, 2 }
 0x146   :  { %p715_p7 = por %p714_p6, %p713_p5 }
 0x147   :  { %v177_v30 = vadd.f32 %v176_v29, %v175_v28 }
 0x148   :  { %p716_p8 = pnand %p715_p7, %p709_p4 }
 0x149   :  { %v178_v31 = vrot.slane %v177_v30, 1 }
 0x14b   :  { %v179_v32 = vadd.f32 %v178_v31, %v177_v30 }
 0x14d   :  { %v180_v33 = vmul.f32 0.125, %v179_v32 }
 0x14f   :  { %v182_v34 = vadd.f32 1e-05, %v180_v33 }
 0x151   :  { %612 = vrsqrt.f32 %v182_v34 }
 0x15b   :  { %v613_v39 = vpop.eup %612 }
 0x15c   :  { %v184_v40 = vmul.f32 %v613_v39, %v181_v37 }
 0x15e   :  { %v186_v42 = vmul.f32 %v184_v40, %v171_v24  ;;  %v192_v43 = vrot.slane %v184_v40, %v876_v38 }
 0x160   :  { %v187_v44 = vsub.f32 %v185_v41, %v186_v42  ;;  %v194_v45 = vmul.f32 %v192_v43, %v158_v14 }
 0x162   :  { %v199_v46 = vrot.slane %v187_v44, %v876_v38 }
 0x164   :  { %v201_v47 = vadd.f32 %v199_v46, %v194_v45 }
 0x166   :  { %v202_v48 = vmax.f32 %v201_v47, 0.0 }
 0x168   :  { %v203_v49 = vpack.c.bf16 %v202_v48, %v202_v48 }
 0x16a   :  { %560 = vmatmul.mubr.bf16.vlgmr.msra.gmra.mrb[0].mxu1 %v203_v49 }
 0x23d   :  { %v302_v58 = vpop.f32.mrb[0].mxu1 }
 0x23e   :  { %v308_v59 = vrot.slane %v302_v58, 4  ;;  %v561_v60 = vpop.f32.mrb[1].mxu1 }
 0x23f   :  { %v305_v61 = vpop.f32.mrb[2].mxu1 }
 0x240   :  { %v309_v62 = vadd.f32 %v308_v59, %v302_v58  ;;  %v562_v63 = vpop.f32.mrb[3].mxu1 }
 0x242   :  { %v310_v1 = vrot.slane %v309_v62, 2 }
 0x244   :  { %v311_v2 = vadd.f32 %v310_v1, %v309_v62 }
 0x246   :  { %v312_v3 = vrot.slane %v311_v2, 1 }
 0x248   :  { %v313_v4 = vadd.f32 %v312_v3, %v311_v2 }
 0x24a   :  { %v314_v5 = vmul.f32 0.125, %v313_v4 }
 0x24c   :  { %v315_v6 = vsub.f32 %v302_v58, %v314_v5 }
 0x24e   :  { %v316_v7 = vmul.f32 %v315_v6, %v315_v6 }
 0x250   :  { %v317_v8 = vrot.slane %v316_v7, 4 }
 0x252   :  { %v318_v9 = vadd.f32 %v317_v8, %v316_v7 }
 0x254   :  { %v319_v10 = vrot.slane %v318_v9, 2 }
 0x256   :  { %v320_v11 = vadd.f32 %v319_v10, %v318_v9 }
 0x258   :  { %v321_v0 = vrot.slane %v320_v11, 1 }
 0x25a   :  { %v322_v12 = vadd.f32 %v321_v0, %v320_v11 }
 0x25c   :  { %v323_v13 = vmul.f32 0.125, %v322_v12 }
 0x25e   :  { %v325_v14 = vadd.f32 1e-05, %v323_v13 }
 0x260   :  { %614 = vrsqrt.f32 %v325_v14 }
 0x26a   :  { %v615_v16 = vpop.eup %614 }
 0x26b   :  { %v327_v17 = vmul.f32 %v615_v16, %v324_v15 }
 0x26d   :  { %v329_v19 = vmul.f32 %v327_v17, %v314_v5  ;;  %v335_v20 = vrot.slane %v327_v17, %v876_v38 }
 0x26f   :  { %v330_v21 = vsub.f32 %v328_v18, %v329_v19  ;;  %v337_v22 = vmul.f32 %v335_v20, %v302_v58 }
 0x271   :  { %v342_v23 = vrot.slane %v330_v21, %v876_v38 }
 0x273   :  { %v344_v24 = vadd.f32 %v342_v23, %v337_v22 }
 0x275   :  { %v345_v25 = vmax.f32 %v344_v24, 0.0 }
 0x277   :  { %v346_v26 = vpack.c.bf16 %v345_v25, %v345_v25 }
 0x279   :  { %580 = vmatmul.mubr.bf16.vlgmr.msra.gmra.mrb[4].mxu0 %v346_v26 }
 0x34c   :  { %v452_v28 = vpop.f32.mrb[4].mxu0 }
 0x34d   :  { %v453_v29 = vadd.f32 %v499_v27, %v452_v28  ;;  %v581_v30 = vpop.f32.mrb[5].mxu0 }
 0x34e   :  { %v455_v31 = vpop.f32.mrb[6].mxu0 }
 0x34f   :  { %458 = vmax.xlane.f32.xlu0 %v453_v29  ;;  %v582_v32 = vpop.f32.mrb[7].mxu0 }
 0x3dc   :  { %v459_v33 = vpop.xlane.xlu0 %458 }
 0x3dd   :  { %v460_v34 = vsub.f32 %v453_v29, %v459_v33 }
 0x3df   :  { %v461_v35 = vmul.f32 1.442695, %v460_v34 }
 0x3e1   :  { %616 = vpow2.f32 %v461_v35 }
 0x3eb   :  { %v617_v36 = vpop.eup %616 }
 0x3ec   :  { %463 = vadd.xlane.f32.xlu0 %v617_v36 }
 0x479   :  { %v464_v37 = vpop.xlane.xlu0 %463 }
 0x47a   :  { %618 = vlog2.f32 %v464_v37 }
 0x484   :  { %v619_v38 = vpop.eup %618 }
 0x485   :  { %v466_v39 = vmul.f32 0.6931472, %v619_v38 }
 0x487   :  { %v467_v40 = vsub.f32 %v460_v34, %v466_v39 }
 0x489   :  { %468 = vst [vmem:[#allocation10] sm:$0xff] %v467_v40 }
 0x48a   :  { %719 = shalt.err (!%p716_p8)
}
 0x48b   :  { %s720_s25 = scalar_lea.hbm %s922_s9, 128 }
 0x48c   :  { %p721_p9 = scmp.ne.s32.totalorder %s922_s9, %s720_s25  ;;  %p724_p10 = scmp.lt.u32.totalorder %s720_s25, %s922_s9 }
 0x48e   :  { %p726_p11 = pnand %p724_p10, %p721_p9 }
 0x490   :  { %729 = shalt.err (!%p726_p11)
}
 0x491   :  { %478 = dma.vmem_to_hbm [thread:$0]  %s476_s6, 128, %s922_s9, [#allocation4]  }
 0x492   :  { %736 = dma.done.wait [#allocation4], 128  }
 0x493   :  { %737 = vsyncadd [#allocation4], 4294967168 }
 0x494   :  { %482 = vsyncpa [#allocation3], 1 }
 0x495   :  { %483 = vsyncpa [#allocation6], 1 }
 0x496   :  { %484 = vsyncpa [#allocation9], 1 }
 0x497   :  { %485 = vsyncpa [#allocation4], 1 }

</bundles_post_ra>
